<compile_context>
chip_gen: v6e
topology: v6e:2x2x1
jax: 0.10.0
libtpu: 0.0.40
codegen_flags: <defaults>
</compile_context>

<pallas_src>
import functools

import jax
import jax.numpy as jnp
from jax.experimental import pallas as pl
from jax.experimental.pallas import tpu as pltpu


def actor_kernel(s_ref, w1_ref, b1_ref, w2_ref, b2_ref, w3_ref, b3_ref, o_ref):
    """One batch tile: 3 MXU matmuls (bf16 operands, f32 acc) + VPU/EUP epilogue.

    Layouts (batch on the 128-lane axis):
      s_ref : (state_dim, TB)    bf16
      wN    : (out, in)          bf16   (PyTorch layout, so y = W @ x)
      bN    : (out, 1)           f32    (broadcasts across lanes)
      o_ref : (action_dim, TB)   f32    lane-dense stores (TB % 128 == 0)

    The tile is processed in 256-lane sub-chunks so the (64, chunk) f32
    intermediates stay within the 64-vreg file even for very large TB.
    """
    tb = s_ref.shape[1]
    chunk = 256 if tb % 256 == 0 else 128   # TB is always a multiple of 128
    n_chunks = tb // chunk

    # Weights/biases are tiny; read them once per grid step (VMEM-resident).
    w1 = w1_ref[...]
    b1 = b1_ref[...]
    w2 = w2_ref[...]
    b2 = b2_ref[...]
    w3 = w3_ref[...]
    b3 = b3_ref[...]

    def body(c, carry):
        col = pl.multiple_of(c * chunk, chunk)
        st = s_ref[:, pl.ds(col, chunk)]                       # (state_dim, chunk) bf16

        h1 = jnp.dot(w1, st, preferred_element_type=jnp.float32) + b1
        h1 = jnp.maximum(h1, 0.0)

        h2 = jnp.dot(w2, h1.astype(jnp.bfloat16),
                     preferred_element_type=jnp.float32) + b2
        h2 = jnp.maximum(h2, 0.0)

        h3 = jnp.dot(w3, h2.astype(jnp.bfloat16),
                     preferred_element_type=jnp.float32) + b3
        o_ref[:, pl.ds(col, chunk)] = jnp.tanh(h3).astype(o_ref.dtype)
        return carry

    jax.lax.fori_loop(0, n_chunks, body, 0, unroll=True)


def _resident(arr):
    # Full-array block with a constant index_map: DMA'd once, VMEM-resident
    # across all batch tiles.
    return pl.BlockSpec(arr.shape, lambda i: (0, 0))


def _round_up(x, m):
    return ((x + m - 1) // m) * m


def _pick_tile(batch, batch_tile):
    """Batch tile: multiple of 128, as large as the budget allows, but capped so
    there are >= 2 tiles whenever the batch has >= 2 lane groups (v7x megacore)."""
    n128 = pl.cdiv(batch, 128)
    tb = max(128, min((batch_tile // 128) * 128, n128 * 128))
    if n128 >= 2:
        tb = min(tb, 128 * pl.cdiv(n128, 2))
    return tb


@functools.partial(jax.jit, static_argnames=("batch_tile",))
def actor_forward_lane_major(s_t, params, *, batch_tile=2048):
    """Lane-major fast path: s_t is (state_dim, batch) with the batch on the lane
    axis; returns (action_dim, batch) f32.  No wrapper-side layout passes."""
    w1, b1, w2, b2, w3, b3 = params
    state_dim, batch = s_t.shape
    action_dim = w3.shape[0]

    tb = _pick_tile(batch, batch_tile)
    nb = pl.cdiv(batch, tb)

    return pl.pallas_call(
        actor_kernel,
        out_shape=jax.ShapeDtypeStruct((action_dim, batch), jnp.float32),
        grid=(nb,),
        in_specs=[
            pl.BlockSpec((state_dim, tb), lambda i: (0, i)),
            _resident(w1), _resident(b1),
            _resident(w2), _resident(b2),
            _resident(w3), _resident(b3),
        ],
        out_specs=pl.BlockSpec((action_dim, tb), lambda i: (0, i)),
        compiler_params=pltpu.CompilerParams(
            dimension_semantics=("parallel",),
        ),
    )(s_t.astype(jnp.bfloat16), w1, b1, w2, b2, w3, b3)


@functools.partial(jax.jit, static_argnames=("batch_tile",))
def actor_forward(s, params, *, batch_tile=2048):
    """PyTorch-layout forward: s is (batch, state_dim) f32; returns
    (batch, action_dim) f32.  Does one fused cast+transpose+pad pass to present
    the lane-major slab, then a slice+transpose of the small output."""
    batch, _ = s.shape

    tb = _pick_tile(batch, batch_tile)
    padded = _round_up(batch, tb)

    # Single fused XLA pass: f32 -> bf16 cast, transpose, and zero-pad of the
    # lane (batch) axis up to the tile boundary.
    s_t = jnp.pad(s.astype(jnp.bfloat16).T, ((0, 0), (0, padded - batch)))

    out_t = actor_forward_lane_major(s_t, params, batch_tile=batch_tile)

    # Back to the PyTorch (batch, action_dim) layout, dropping batch padding.
    return out_t[:, :batch].T


def init_actor_params(key, state_dim, action_dim, hidden=64):
    """Mimics PyTorch nn.Linear default init (U[-1/sqrt(fan_in), +1/sqrt(fan_in)]).

    Weights stay in the PyTorch (out_features, in_features) layout, cast to bf16
    for the MXU; biases stay f32 with shape (out_features, 1) so they broadcast
    over the lane (batch) axis inside the kernel.  (bf16 weights differ from a
    true f32 PyTorch Actor at ~1e-3 relative — fine for RL.)
    """
    keys = jax.random.split(key, 6)

    def linear(kw, kb, fan_in, fan_out):
        bound = 1.0 / jnp.sqrt(jnp.float32(fan_in))
        w = jax.random.uniform(kw, (fan_out, fan_in), jnp.float32, -bound, bound)
        b = jax.random.uniform(kb, (fan_out, 1), jnp.float32, -bound, bound)
        return w.astype(jnp.bfloat16), b

    w1, b1 = linear(keys[0], keys[1], state_dim, hidden)
    w2, b2 = linear(keys[2], keys[3], hidden, hidden)
    w3, b3 = linear(keys[4], keys[5], hidden, action_dim)
    return (w1, b1, w2, b2, w3, b3)


def actor_reference(s, params):
    """Pure-JAX f32 reference for correctness checks (same bf16 weights)."""
    w1, b1, w2, b2, w3, b3 = params
    w1, w2, w3 = (w.astype(jnp.float32) for w in (w1, w2, w3))
    a = jnp.maximum(s @ w1.T + b1.T, 0.0)
    a = jnp.maximum(a @ w2.T + b2.T, 0.0)
    return jnp.tanh(a @ w3.T + b3.T)


if __name__ == "__main__":
    key = jax.random.PRNGKey(0)
    k_s, k_p, k_big, k_lm = jax.random.split(key, 4)

    state_dim, action_dim = 16, 8
    params = init_actor_params(k_p, state_dim, action_dim)

    # Small shape consistent with the module (degenerate RL eval batch).
    s_small = jax.random.normal(k_s, (2, state_dim), jnp.float32)
    out_small = jax.block_until_ready(actor_forward(s_small, params))
    ref_small = actor_reference(s_small, params)
    assert out_small.shape == (2, action_dim)
    assert jnp.allclose(out_small, ref_small, atol=3e-2, rtol=3e-2)

    # Larger, non-tile-multiple batch exercises padding + the >=2-tile grid
    # (both v7x TensorCores get a tile).
    s_big = jax.random.normal(k_big, (300, state_dim), jnp.float32)
    out_big = jax.block_until_ready(actor_forward(s_big, params))
    ref_big = actor_reference(s_big, params)
    assert out_big.shape == (300, action_dim)
    assert jnp.allclose(out_big, ref_big, atol=3e-2, rtol=3e-2)

    # Lane-major fast path: zero wrapper layout plumbing.
    s_lm = jax.random.normal(k_lm, (state_dim, 512), jnp.float32)
    out_lm = jax.block_until_ready(actor_forward_lane_major(s_lm, params))
    ref_lm = actor_reference(s_lm.T, params).T
    assert out_lm.shape == (action_dim, 512)
    assert jnp.allclose(out_lm, ref_lm, atol=3e-2, rtol=3e-2)

    print("KERNEL_OK")
</pallas_src>

<mosaic_0001>
module attributes {stable_mosaic.version = 11 : i64} {
  func.func @actor_kernel(%arg0: i32, %arg1: memref<16x128xbf16, #tpu.memory_space<vmem>>, %arg2: memref<64x16xbf16, #tpu.memory_space<vmem>>, %arg3: memref<64x1xf32, #tpu.memory_space<vmem>>, %arg4: memref<64x64xbf16, #tpu.memory_space<vmem>>, %arg5: memref<64x1xf32, #tpu.memory_space<vmem>>, %arg6: memref<8x64xbf16, #tpu.memory_space<vmem>>, %arg7: memref<8x1xf32, #tpu.memory_space<vmem>>, %arg8: memref<8x128xf32, #tpu.memory_space<vmem>>) attributes {dimension_semantics = [#tpu.dimension_semantics<parallel>], iteration_bounds = array<i64: 1>, scalar_prefetch = 0 : i64, scratch_operands = 0 : i64, tpu.core_type = #tpu.core_type<tc>, window_params = [{transform_indices = @transform_0, window_bounds = array<i64: 16, 128>}, {pipeline_mode = #tpu.pipeline_mode<synchronous>, transform_indices = @transform_1, window_bounds = array<i64: 64, 16>}, {pipeline_mode = #tpu.pipeline_mode<synchronous>, transform_indices = @transform_2, window_bounds = array<i64: 64, 1>}, {pipeline_mode = #tpu.pipeline_mode<synchronous>, transform_indices = @transform_3, window_bounds = array<i64: 64, 64>}, {pipeline_mode = #tpu.pipeline_mode<synchronous>, transform_indices = @transform_4, window_bounds = array<i64: 64, 1>}, {pipeline_mode = #tpu.pipeline_mode<synchronous>, transform_indices = @transform_5, window_bounds = array<i64: 8, 64>}, {pipeline_mode = #tpu.pipeline_mode<synchronous>, transform_indices = @transform_6, window_bounds = array<i64: 8, 1>}, {transform_indices = @transform_7, window_bounds = array<i64: 8, 128>}]} {
    %c0 = arith.constant 0 : index
    %c0_0 = arith.constant 0 : index
    %0 = vector.load %arg2[%c0, %c0_0] : memref<64x16xbf16, #tpu.memory_space<vmem>>, vector<64x16xbf16>
    %c0_1 = arith.constant 0 : index
    %c0_2 = arith.constant 0 : index
    %1 = vector.load %arg3[%c0_1, %c0_2] : memref<64x1xf32, #tpu.memory_space<vmem>>, vector<64x1xf32>
    %c0_3 = arith.constant 0 : index
    %c0_4 = arith.constant 0 : index
    %2 = vector.load %arg4[%c0_3, %c0_4] : memref<64x64xbf16, #tpu.memory_space<vmem>>, vector<64x64xbf16>
    %c0_5 = arith.constant 0 : index
    %c0_6 = arith.constant 0 : index
    %3 = vector.load %arg5[%c0_5, %c0_6] : memref<64x1xf32, #tpu.memory_space<vmem>>, vector<64x1xf32>
    %c0_7 = arith.constant 0 : index
    %c0_8 = arith.constant 0 : index
    %4 = vector.load %arg6[%c0_7, %c0_8] : memref<8x64xbf16, #tpu.memory_space<vmem>>, vector<8x64xbf16>
    %c0_9 = arith.constant 0 : index
    %c0_10 = arith.constant 0 : index
    %5 = vector.load %arg7[%c0_9, %c0_10] : memref<8x1xf32, #tpu.memory_space<vmem>>, vector<8x1xf32>
    %c0_i32 = arith.constant 0 : i32
    %c128_i32 = arith.constant 128 : i32
    %6 = arith.muli %c0_i32, %c128_i32 : i32
    %7 = tpu.assume_multiple %6, 128 : i32
    %c0_11 = arith.constant 0 : index
    %8 = arith.index_cast %7 : i32 to index
    %9 = vector.load %arg1[%c0_11, %8] : memref<16x128xbf16, #tpu.memory_space<vmem>>, vector<16x128xbf16>
    %cst = arith.constant dense<0.000000e+00> : vector<64x128xf32>
    %10 = tpu.matmul %0, %9, %cst {dimension_numbers = #tpu.dot_dimension_numbers<[1], [0], [0], [1], [0, 0, 1, 1], [], []>} : vector<64x16xbf16>, vector<16x128xbf16>, vector<64x128xf32> -> vector<64x128xf32>
    %11 = vector.broadcast %1 : vector<64x1xf32> to vector<64x128xf32>
    %12 = arith.addf %10, %11 : vector<64x128xf32>
    %cst_12 = arith.constant 0.000000e+00 : f32
    %13 = vector.broadcast %cst_12 : f32 to vector<64x128xf32>
    %14 = arith.maximumf %12, %13 : vector<64x128xf32>
    %15 = arith.truncf %14 : vector<64x128xf32> to vector<64x128xbf16>
    %cst_13 = arith.constant dense<0.000000e+00> : vector<64x128xf32>
    %16 = tpu.matmul %2, %15, %cst_13 {dimension_numbers = #tpu.dot_dimension_numbers<[1], [0], [0], [1], [0, 0, 1, 1], [], []>} : vector<64x64xbf16>, vector<64x128xbf16>, vector<64x128xf32> -> vector<64x128xf32>
    %17 = vector.broadcast %3 : vector<64x1xf32> to vector<64x128xf32>
    %18 = arith.addf %16, %17 : vector<64x128xf32>
    %cst_14 = arith.constant 0.000000e+00 : f32
    %19 = vector.broadcast %cst_14 : f32 to vector<64x128xf32>
    %20 = arith.maximumf %18, %19 : vector<64x128xf32>
    %21 = arith.truncf %20 : vector<64x128xf32> to vector<64x128xbf16>
    %cst_15 = arith.constant dense<0.000000e+00> : vector<8x128xf32>
    %22 = tpu.matmul %4, %21, %cst_15 {dimension_numbers = #tpu.dot_dimension_numbers<[1], [0], [0], [1], [0, 0, 1, 1], [], []>} : vector<8x64xbf16>, vector<64x128xbf16>, vector<8x128xf32> -> vector<8x128xf32>
    %23 = vector.broadcast %5 : vector<8x1xf32> to vector<8x128xf32>
    %24 = arith.addf %22, %23 : vector<8x128xf32>
    %25 = math.tanh %24 : vector<8x128xf32>
    %c0_16 = arith.constant 0 : index
    %26 = arith.index_cast %7 : i32 to index
    %27 = vector.load %arg8[%c0_16, %26] : memref<8x128xf32, #tpu.memory_space<vmem>>, vector<8x128xf32>
    tpu.vector_store %arg8[%c0_16, %26], %25 {strides = array<i32>} : memref<8x128xf32, #tpu.memory_space<vmem>>, vector<8x128xf32>,
    %c1_i32 = arith.constant 1 : i32
    return
  }
  func.func @transform_0(%arg0: i32) -> (i32, i32) {
    %c0_i32 = arith.constant 0 : i32
    %c0_i32_0 = arith.constant 0 : i32
    return %c0_i32, %arg0 : i32, i32
  }
  func.func @transform_1(%arg0: i32) -> (i32, i32) {
    %c0_i32 = arith.constant 0 : i32
    %c0_i32_0 = arith.constant 0 : i32
    %c0_i32_1 = arith.constant 0 : i32
    return %c0_i32, %c0_i32_0 : i32, i32
  }
  func.func @transform_2(%arg0: i32) -> (i32, i32) {
    %c0_i32 = arith.constant 0 : i32
    %c0_i32_0 = arith.constant 0 : i32
    %c0_i32_1 = arith.constant 0 : i32
    return %c0_i32, %c0_i32_0 : i32, i32
  }
  func.func @transform_3(%arg0: i32) -> (i32, i32) {
    %c0_i32 = arith.constant 0 : i32
    %c0_i32_0 = arith.constant 0 : i32
    %c0_i32_1 = arith.constant 0 : i32
    return %c0_i32, %c0_i32_0 : i32, i32
  }
  func.func @transform_4(%arg0: i32) -> (i32, i32) {
    %c0_i32 = arith.constant 0 : i32
    %c0_i32_0 = arith.constant 0 : i32
    %c0_i32_1 = arith.constant 0 : i32
    return %c0_i32, %c0_i32_0 : i32, i32
  }
  func.func @transform_5(%arg0: i32) -> (i32, i32) {
    %c0_i32 = arith.constant 0 : i32
    %c0_i32_0 = arith.constant 0 : i32
    %c0_i32_1 = arith.constant 0 : i32
    return %c0_i32, %c0_i32_0 : i32, i32
  }
  func.func @transform_6(%arg0: i32) -> (i32, i32) {
    %c0_i32 = arith.constant 0 : i32
    %c0_i32_0 = arith.constant 0 : i32
    %c0_i32_1 = arith.constant 0 : i32
    return %c0_i32, %c0_i32_0 : i32, i32
  }
  func.func @transform_7(%arg0: i32) -> (i32, i32) {
    %c0_i32 = arith.constant 0 : i32
    %c0_i32_0 = arith.constant 0 : i32
    return %c0_i32, %arg0 : i32, i32
  }
}

</mosaic_0001>

<bundles_post_ra>
// kernel: actor_forward_lane_major.1
= control target key start
LH: loop header
LB: loop body
LE: loop exit
PB: predicated region body
PF: predicated region fallthrough
CT: control target
= control target key end

     0   :  { %vm130_vm0 = vcmask 130048   ;;  %v547_v3 = vmov 0   ;;  %s684_s0 = inlined_call_operand.vmem [shape: bf16[16,128], index: 0, kind: input, shape index: {}]   ;;  %s685_s1 = inlined_call_operand.vmem [shape: bf16[64,16], index: 1, kind: input, shape index: {}]   ;;  %s686_s2 = inlined_call_operand.vmem [shape: f32[64,1], index: 2, kind: input, shape index: {}]   ;;  %s687_s3 = inlined_call_operand.vmem [shape: bf16[64,64], index: 3, kind: input, shape index: {}]   ;;  %s688_s4 = inlined_call_operand.vmem [shape: f32[64,1], index: 4, kind: input, shape index: {}]   ;;  %s689_s5 = inlined_call_operand.vmem [shape: bf16[8,64], index: 5, kind: input, shape index: {}]   ;;  %s690_s6 = inlined_call_operand.vmem [shape: f32[8,1], index: 6, kind: input, shape index: {}]   ;;  %s691_s7 = inlined_call_operand.hbm [shape: f32[8,128], index: 7, kind: output, shape index: {}]  }
   0x1   :  { %v514_v0 = vld [vmem:[%s684_s0] sm:$0xff]   ;;  %v516_v2 = vld [vmem:[%s685_s1 + $0x8] sm:$0xff]   ;;  %512 = vset.pattern.permute.xlu0 %v547_v3  ;;  %v517_v4 = vld [vmem:[%s685_s1 + $0x10] sm:$0xff]   ;;  %513 = vset.pattern.permute.xlu1 %v547_v3 }
   0x2   :  { %v515_v1 = vld [vmem:[%s685_s1] sm:$0xff]   ;;  %470 = vmatprep.subr.bf16.mxu0 %v514_v0  ;;  %v42_v5 = vld [vmem:[%s686_s2 + $0x30] sm:$0xff]  ;;  %v43_v7 = vld [vmem:[%s686_s2 + $0x38] sm:$0xff] }
   0x3   :  { %471 = vmatpush3.bf16.msra.mxu0 %v514_v0  ;;  %472 = vmatprep.mubr.msk.bf16.mxu0 %vm130_vm0, %v515_v1  ;;  %v40_v6 = vld [vmem:[%s686_s2 + $0x20] sm:$0xff]  ;;  %v41_v8 = vld [vmem:[%s686_s2 + $0x28] sm:$0xff]  ;;  %v518_v9 = vld [vmem:[%s685_s1 + $0x18] sm:$0xff]  }
   0x4   :  { %96 = vperm.xlu0 %512, %v42_v5   ;;  %86 = vperm.xlu1 %513, %v40_v6   ;;  %v38_v10 = vld [vmem:[%s686_s2 + $0x10] sm:$0xff]  ;;  %v39_v11 = vld [vmem:[%s686_s2 + $0x18] sm:$0xff] }
   0x6   :  { %473 = vmatmul.mubr.msk.bf16.vlgmr.msra.gmra.mxu0 %vm130_vm0, %v516_v2 }
   0x7   :  { %476 = vmatprep.mubr.msk.bf16.mxu0 %vm130_vm0, %v517_v4 }
   0x8   :  { %101 = vperm.xlu0 %512, %v43_v7   ;;  %91 = vperm.xlu1 %513, %v41_v8  }
   0x9   :  { %12 = vsyncpa [#allocation3], 0  ;;  %v36_v12 = vld [vmem:[%s686_s2] sm:$0xff]  ;;  %v37_v13 = vld [vmem:[%s686_s2 + $0x8] sm:$0xff]  ;;  %vm280_vm1 = vcmask 523264   ;;  %v548_v63 = vmov 0.0  }
   0xa   :  { %v58_v14 = vld [vmem:[%s688_s4 + $0x30] sm:$0xff]  ;;  %v59_v15 = vld [vmem:[%s688_s4 + $0x38] sm:$0xff]  ;;  %v56_v16 = vld [vmem:[%s688_s4 + $0x20] sm:$0xff]  ;;  %496 = vmatprep.subr.bf16.mxu0 %v548_v63  ;;  %vm549_vm2 = vmmov 0   ;;  %s550_s24 = smov [#allocation2]  }
   0xb   :  { %v57_v17 = vld [vmem:[%s688_s4 + $0x28] sm:$0xff]  ;;  %v54_v18 = vld [vmem:[%s688_s4 + $0x10] sm:$0xff]  ;;  %v55_v19 = vld [vmem:[%s688_s4 + $0x18] sm:$0xff]  ;;  %s426_s25 = sshll.u32 %s550_s24, 4  ;;  %s427_s25 = int_to_ptr.vmem [resolvable:$true] %s426_s25 }
   0xc   :  { %76 = vperm.xlu0 %512, %v38_v10   ;;  %81 = vperm.xlu1 %513, %v39_v11   ;;  %v52_v20 = vld [vmem:[%s688_s4] sm:$0xff]  ;;  %v53_v21 = vld [vmem:[%s688_s4 + $0x8] sm:$0xff]  ;;  %v521_v61 = vld [vmem:[%s687_s3 + $0x10] sm:$0xff]   ;;  %s525_s26 = scalar_lea.vmem %s427_s25, 128  ;;  %p530_p1 = scmp.lt.s32.totalorder %s427_s25, %s427_s25 }
   0xd   :  { %v61_v22 = vld [vmem:[%s690_s6] sm:$0xff]  ;;  %v520_v60 = vld [vmem:[%s687_s3 + $0x8] sm:$0xff]   ;;  %v522_v62 = vld [vmem:[%s687_s3 + $0x18] sm:$0xff]   ;;  %p526_p0 = scmp.ne.s32.totalorder %s427_s25, %s525_s26  ;;  %p531_p2 = scmp.lt.s32.totalorder %s525_s26, %s525_s26 }
   0xe   :  { %477 = vmatmul.mubr.msk.bf16.gmra.mxu0 %vm130_vm0, %v518_v9  ;;  %v519_v23 = vld [vmem:[%s687_s3] sm:$0xff]  }
   0xf   :  { %488 = vmatprep.mubr.msk.bf16.mxu1 %vm280_vm1, %v519_v23  ;;  %504 = vmatprep.mubr.msk.bf16.mxu0 %vm549_vm2, %v548_v63  ;;  %p532_p3 = por %p531_p2, %p530_p1 }
  0x10   :  { %66 = vperm.xlu0 %512, %v36_v12   ;;  %71 = vperm.xlu1 %513, %v37_v13  }
  0x11   :  { %p533_p4 = pnand %p532_p3, %p526_p0 }
  0x14   :  { %252 = vperm.xlu0 %512, %v58_v14   ;;  %257 = vperm.xlu1 %513, %v59_v15  }
  0x18   :  { %242 = vperm.xlu0 %512, %v56_v16   ;;  %247 = vperm.xlu1 %513, %v57_v17  }
  0x1c   :  { %232 = vperm.xlu0 %512, %v54_v18   ;;  %237 = vperm.xlu1 %513, %v55_v19  }
  0x20   :  { %222 = vperm.xlu0 %512, %v52_v20   ;;  %227 = vperm.xlu1 %513, %v53_v21  }
  0x24   :  { %372 = vperm.xlu0 %512, %v61_v22  }
  0x7f   :  { %v87_v24 = vpop.permute.xlu1 %86  ;;  %v97_v26 = vpop.permute.xlu0 %96 }
  0x83   :  { %v92_v29 = vpop.permute.xlu1 %91  ;;  %v102_v31 = vpop.permute.xlu0 %101 }
  0x87   :  { %v82_v35 = vpop.permute.xlu1 %81  ;;  %v77_v39 = vpop.permute.xlu0 %76 }
  0x8b   :  { %v72_v49 = vpop.permute.xlu1 %71  ;;  %v67_v53 = vpop.permute.xlu0 %66 }
  0x8f   :  { %v258_v1 = vpop.permute.xlu1 %257  ;;  %v253_v3 = vpop.permute.xlu0 %252 }
  0x93   :  { %v248_v6 = vpop.permute.xlu1 %247  ;;  %v243_v8 = vpop.permute.xlu0 %242 }
  0x97   :  { %v238_v13 = vpop.permute.xlu1 %237  ;;  %v233_v19 = vpop.permute.xlu0 %232 }
  0xc6   :  { %v474_v25 = vpop.f32.mrf.mxu0 }
  0xc7   :  { %v186_v45 = vadd.f32 %v474_v25, %v77_v39  ;;  %v228_v25 = vpop.permute.xlu1 %227 }
  0xc8   :  { %v177_v27 = vpop.f32.mrf.mxu0 }
  0xc9   :  { %v210_v54 = vmax.f32 %v186_v45, 0.0  ;;  %v178_v55 = vadd.f32 %v177_v27, %v67_v53 }
  0xca   :  { %v475_v28 = vpop.f32.mrf.mxu0 }
  0xcb   :  { %v189_v41 = vadd.f32 %v475_v28, %v82_v35  ;;  %v208_v58 = vmax.f32 %v178_v55, 0.0 }
  0xcc   :  { %v180_v30 = vpop.f32.mrf.mxu0 }
  0xcd   :  { %v211_v50 = vmax.f32 %v189_v41, 0.0  ;;  %v181_v51 = vadd.f32 %v180_v30, %v72_v49 }
  0xce   :  { %v478_v32 = vpop.f32.mrf.mxu0 }
  0xcf   :  { %v202_v34 = vadd.f32 %v478_v32, %v97_v26  ;;  %v217_v56 = vpack.c.bf16 %v211_v50, %v210_v54  ;;  %v209_v57 = vmax.f32 %v181_v51, 0.0 }
  0xd0   :  { %v193_v33 = vpop.f32.mrf.mxu0 }
  0xd1   :  { %v194_v37 = vadd.f32 %v193_v33, %v87_v24  ;;  %v214_v42 = vmax.f32 %v202_v34, 0.0  ;;  %v216_v59 = vpack.c.bf16 %v209_v57, %v208_v58 }
  0xd2   :  { %v479_v36 = vpop.f32.mrf.mxu0 }
  0xd3   :  { %v205_v38 = vadd.f32 %v479_v36, %v102_v31  ;;  %v212_v46 = vmax.f32 %v194_v37, 0.0  ;;  %v60_v36 = vld [vmem:[%s689_s5] sm:$0xf] }
  0xd4   :  { %v196_v40 = vpop.f32.mrf.mxu0 }
  0xd5   :  { %v215_v43 = vmax.f32 %v205_v38, 0.0  ;;  %v197_v44 = vadd.f32 %v196_v40, %v92_v29  ;;  %v223_v29 = vpop.permute.xlu0 %222 }
  0xd7   :  { %v213_v47 = vmax.f32 %v197_v44, 0.0  ;;  %v219_v48 = vpack.c.bf16 %v215_v43, %v214_v42 }
  0xd9   :  { %v218_v52 = vpack.c.bf16 %v213_v47, %v212_v46  ;;  %480 = vmatprep.subr.bf16.mxu1 %v219_v48  ;;  %v373_v37 = vpop.permute.xlu0 %372 }
  0xda   :  { %481 = vmatpush3.bf16.msra.mxu1 %v219_v48 }
  0xdb   :  { %482 = vmatprep.subr.bf16.mxu1 %v218_v52 }
  0xde   :  { %483 = vmatpush3.bf16.msra.mxu1 %v218_v52 }
  0xdf   :  { %484 = vmatprep.subr.bf16.mxu1 %v217_v56 }
  0xe2   :  { %485 = vmatpush3.bf16.msra.mxu1 %v217_v56 }
  0xe3   :  { %486 = vmatprep.subr.bf16.mxu1 %v216_v59 }
  0xe6   :  { %487 = vmatpush3.bf16.msra.mxu1 %v216_v59 }
  0xe9   :  { %489 = vmatmul.mubr.msk.bf16.vlgmr.msra.gmra.mxu1 %vm280_vm1, %v520_v60 }
  0xea   :  { %492 = vmatprep.mubr.msk.bf16.mxu1 %vm280_vm1, %v521_v61 }
  0xf1   :  { %493 = vmatmul.mubr.msk.bf16.gmra.mxu1 %vm280_vm1, %v522_v62 }
 0x1a9   :  { %v490_v0 = vpop.f32.mrf.mxu1 }
 0x1aa   :  { %v336_v23 = vadd.f32 %v490_v0, %v233_v19 }
 0x1ab   :  { %v327_v2 = vpop.f32.mrf.mxu1 }
 0x1ac   :  { %v360_v30 = vmax.f32 %v336_v23, 0.0  ;;  %v328_v31 = vadd.f32 %v327_v2, %v223_v29 }
 0x1ad   :  { %v491_v4 = vpop.f32.mrf.mxu1 }
 0x1ae   :  { %v339_v20 = vadd.f32 %v491_v4, %v238_v13  ;;  %v358_v34 = vmax.f32 %v328_v31, 0.0 }
 0x1af   :  { %v330_v5 = vpop.f32.mrf.mxu1 }
 0x1b0   :  { %v361_v26 = vmax.f32 %v339_v20, 0.0  ;;  %v331_v27 = vadd.f32 %v330_v5, %v228_v25 }
 0x1b1   :  { %v494_v7 = vpop.f32.mrf.mxu1 }
 0x1b2   :  { %v352_v10 = vadd.f32 %v494_v7, %v253_v3  ;;  %v367_v32 = vpack.c.bf16 %v361_v26, %v360_v30  ;;  %v359_v33 = vmax.f32 %v331_v27, 0.0 }
 0x1b3   :  { %v343_v9 = vpop.f32.mrf.mxu1 }
 0x1b4   :  { %v364_v15 = vmax.f32 %v352_v10, 0.0  ;;  %v344_v16 = vadd.f32 %v343_v9, %v243_v8  ;;  %v366_v35 = vpack.c.bf16 %v359_v33, %v358_v34 }
 0x1b5   :  { %v495_v11 = vpop.f32.mrf.mxu1 }
 0x1b6   :  { %v355_v12 = vadd.f32 %v495_v11, %v258_v1  ;;  %v362_v24 = vmax.f32 %v344_v16, 0.0 }
 0x1b7   :  { %v346_v14 = vpop.f32.mrf.mxu1 }
 0x1b8   :  { %v365_v17 = vmax.f32 %v355_v12, 0.0  ;;  %v347_v18 = vadd.f32 %v346_v14, %v248_v6 }
 0x1ba   :  { %v369_v21 = vpack.c.bf16 %v365_v17, %v364_v15  ;;  %v363_v22 = vmax.f32 %v347_v18, 0.0 }
 0x1bc   :  { %497 = vmatpush3.bf16.msra.mxu0 %v369_v21  ;;  %v368_v28 = vpack.c.bf16 %v363_v22, %v362_v24 }
 0x1bd   :  { %498 = vmatprep.subr.bf16.mxu0 %v548_v63 }
 0x1c0   :  { %499 = vmatpush3.bf16.msra.mxu0 %v368_v28 }
 0x1c1   :  { %500 = vmatprep.subr.bf16.mxu0 %v548_v63 }
 0x1c4   :  { %501 = vmatpush3.bf16.msra.mxu0 %v367_v32 }
 0x1c5   :  { %502 = vmatprep.subr.bf16.mxu0 %v548_v63 }
 0x1c8   :  { %503 = vmatpush3.bf16.msra.mxu0 %v366_v35 }
 0x1cb   :  { %505 = vmatmul.mubr.msk.bf16.vlgmr.msra.gmra.mxu0 %vm280_vm1, %v60_v36 }
 0x28b   :  { %v412_v38 = vpop.f32.mrf.mxu0 }
 0x28c   :  { %v413_v39 = vadd.f32 %v412_v38, %v373_v37 }
 0x28d   :  { %v506_v40 = vpop.f32.mrf.mxu0 }
 0x28e   :  { %523 = vtanh.f32 %v413_v39 }
 0x28f   :  { %v415_v41 = vpop.f32.mrf.mxu0 }
 0x291   :  { %v507_v42 = vpop.f32.mrf.mxu0 }
 0x29b   :  { %v524_v43 = vpop.eup %523 }
 0x29c   :  { %419 = vst [vmem:[#allocation2] sm:$0xff] %v524_v43 }
 0x29d   :  { %536 = shalt.err (!%p533_p4)
}
 0x29e   :  { %429 = dma.vmem_to_hbm [thread:$0]  %s427_s25, 128, %s691_s7, [#allocation3]  }
 0x29f   :  { %545 = dma.done.wait [#allocation3], 128  }
 0x2a0   :  { %546 = vsyncadd [#allocation3], 4294967168 }
 0x2a1   :  { %433 = vsyncpa [#allocation3], 1 }

</bundles_post_ra>
